<compile_context>
chip_gen: v5e
topology: v5e:2x2
jax: 0.10.0
libtpu: 0.0.40
codegen_flags: <defaults>
</compile_context>

<pallas_src>
import jax
import jax.numpy as jnp
from jax.experimental import pallas as pl
from jax.experimental.pallas import tpu as pltpu


def _round_up(x, m):
    return ((x + m - 1) // m) * m


def baseline_mlp_kernel(x_ref, w1_ref, b1_ref, w2_ref, b2_ref, o_ref):
    # x_ref : (TB, dim_context)          streamed batch rows (untransposed)
    # w1_ref: (dim_hidden, dim_context)  PyTorch-native fc1.weight (VMEM-resident)
    # b1_ref: (dim_hidden, 1)            fc1.bias as a column (broadcasts over lanes)
    # w2_ref: (dim_hidden, 1)            fc2.weight as a column (VMEM-resident)
    # b2_ref: (1, 1) in SMEM             fc2.bias scalar
    # o_ref : (1, TB)                    lane-dense output stores
    #
    # fc1 on the MXU: contract dim_context of both operands -> (dim_hidden, TB),
    # i.e. batch on lanes.  Relayout of the (TB, dc) block happens in VMEM on
    # the otherwise-idle XLU; HBM traffic is unchanged.
    h = jax.lax.dot_general(
        w1_ref[...], x_ref[...],
        dimension_numbers=(((1,), (1,)), ((), ())),
        preferred_element_type=jnp.float32,
        precision=jax.lax.Precision.HIGHEST,   # f32 parity with the PyTorch baseline
    )
    h = jnp.maximum(h + b1_ref[...], 0.0)
    # fc2 (N=1): VPU multiply + sublane reduce instead of a degenerate MXU matmul.
    o_ref[...] = jnp.sum(h * w2_ref[...], axis=0, keepdims=True) + b2_ref[0, 0]


def baseline_forward(context, w1, b1, w2, b2, *,
                     vmem_budget_bytes=24 << 20,   # block working set (see accounting)
                     max_block_b=1 << 17):
    """
    context: (B, dim_context) f32
    w1: (dim_hidden, dim_context), b1: (dim_hidden,)   -- PyTorch fc1 layout
    w2: (1, dim_hidden),           b2: (1,)            -- PyTorch fc2 layout
    returns: (B, 1) f32  ==  relu(context @ w1.T + b1) @ w2.T + b2
    """
    B, dim_context = context.shape
    dim_hidden = w1.shape[0]

    # --- VMEM accounting per batch row (one lane of the output tile) ----------
    # x block (tb, dc) f32 lane-pads dc -> 128 in VMEM and is double-buffered;
    # the (dim_hidden, tb) f32 intermediates (matmul result, relu / h*w2 temps)
    # add ~3*dim_hidden bytes/row; the (1, tb) output adds 2*4 bytes/row.
    lane_padded_dc = _round_up(dim_context, 128)
    bytes_per_row = (2 * lane_padded_dc * 4      # x tile, double-buffered, lane-padded
                     + 3 * dim_hidden * 4        # h + elementwise temps (f32)
                     + 2 * 4)                    # output tile, double-buffered
    tb_max = (vmem_budget_bytes // bytes_per_row) // 128 * 128
    tb_max = max(128, min(tb_max, max_block_b))

    # Batch tile: multiple of 128 (lanes of the output); never larger than the
    # rounded-up batch.  Last grid step may be a partial tile (no padding pass).
    tb = min(tb_max, _round_up(B, 128))
    grid = (pl.cdiv(B, tb),)

    # Leave the scoped-VMEM limit comfortably above the block working set.
    vmem_limit = max(32 << 20, min(vmem_budget_bytes + (8 << 20), 100 << 20))

    # Tiny layout plumbing on the weights only (no pass over x).
    x = context.astype(jnp.float32)
    b1_col = b1.reshape(dim_hidden, 1).astype(jnp.float32)
    w2_col = w2.reshape(1, dim_hidden).T.astype(jnp.float32)   # (dh, 1)
    b2_s = b2.reshape(1, 1).astype(jnp.float32)

    out_row = pl.pallas_call(
        baseline_mlp_kernel,
        out_shape=jax.ShapeDtypeStruct((1, B), jnp.float32),
        grid=grid,
        in_specs=[
            pl.BlockSpec((tb, dim_context), lambda i: (i, 0)),           # streamed x rows
            pl.BlockSpec((dim_hidden, dim_context), lambda i: (0, 0)),   # resident W1
            pl.BlockSpec((dim_hidden, 1), lambda i: (0, 0)),             # resident b1
            pl.BlockSpec((dim_hidden, 1), lambda i: (0, 0)),             # resident w2
            pl.BlockSpec((1, 1), lambda i: (0, 0),
                         memory_space=pltpu.MemorySpace.SMEM),           # scalar b2
        ],
        out_specs=pl.BlockSpec((1, tb), lambda i: (0, i)),
        compiler_params=pltpu.CompilerParams(
            dimension_semantics=("parallel",),    # shard batch tiles across TCs (v7x)
            vmem_limit_bytes=vmem_limit,
        ),
    )(x, w1.astype(jnp.float32), b1_col, w2_col, b2_s)

    # Back to the PyTorch output shape (B, 1).
    return out_row.reshape(B, 1)


def init_params(dim_context, dim_hidden, seed=0):
    """Deterministic init mimicking nn.Linear's U(-1/sqrt(fan_in), 1/sqrt(fan_in)),
    stored in PyTorch-native layout: weight (out, in), bias (out,)."""
    k = jax.random.PRNGKey(seed)
    k1, k2, k3, k4 = jax.random.split(k, 4)
    bound1 = 1.0 / jnp.sqrt(dim_context)
    bound2 = 1.0 / jnp.sqrt(dim_hidden)
    w1 = jax.random.uniform(k1, (dim_hidden, dim_context), jnp.float32, -bound1, bound1)
    b1 = jax.random.uniform(k2, (dim_hidden,), jnp.float32, -bound1, bound1)
    w2 = jax.random.uniform(k3, (1, dim_hidden), jnp.float32, -bound2, bound2)
    b2 = jax.random.uniform(k4, (1,), jnp.float32, -bound2, bound2)
    return w1, b1, w2, b2


def _ref(context, w1, b1, w2, b2):
    return jnp.maximum(context @ w1.T + b1, 0.0) @ w2.T + b2


if __name__ == "__main__":
    dim_context = 16
    dim_hidden = 32

    w1, b1, w2, b2 = init_params(dim_context, dim_hidden, seed=0)

    # Small-batch check (single partial tile: block larger than the array).
    key = jax.random.PRNGKey(0)
    ctx_small = jax.random.normal(key, (8, dim_context), jnp.float32)
    out_small = jax.block_until_ready(baseline_forward(ctx_small, w1, b1, w2, b2))
    assert out_small.shape == (8, 1)
    assert jnp.allclose(out_small, _ref(ctx_small, w1, b1, w2, b2), atol=2e-5, rtol=2e-5)

    # Non-multiple batch, default (single large tile) path.
    ctx_big = jax.random.normal(jax.random.PRNGKey(1), (1000, dim_context), jnp.float32)
    out_big = jax.block_until_ready(baseline_forward(ctx_big, w1, b1, w2, b2))
    assert out_big.shape == (1000, 1)
    assert jnp.allclose(out_big, _ref(ctx_big, w1, b1, w2, b2), atol=2e-5, rtol=2e-5)

    # Same batch forced through grid > 1 with a ragged last tile (exercises the
    # partial-block read/masked-store path without any wrapper padding).
    out_big2 = jax.block_until_ready(
        baseline_forward(ctx_big, w1, b1, w2, b2, max_block_b=256))
    assert out_big2.shape == (1000, 1)
    assert jnp.allclose(out_big2, _ref(ctx_big, w1, b1, w2, b2), atol=2e-5, rtol=2e-5)

    print("KERNEL_OK")
</pallas_src>

<mosaic_0001>
module attributes {stable_mosaic.version = 11 : i64} {
  func.func @baseline_mlp_kernel(%arg0: i32, %arg1: memref<128x16xf32, #tpu.memory_space<vmem>>, %arg2: memref<32x16xf32, #tpu.memory_space<vmem>>, %arg3: memref<32x1xf32, #tpu.memory_space<vmem>>, %arg4: memref<32x1xf32, #tpu.memory_space<vmem>>, %arg5: memref<1x1xf32, #tpu.memory_space<smem>>, %arg6: memref<1x128xf32, #tpu.memory_space<vmem>>) attributes {dimension_semantics = [#tpu.dimension_semantics<parallel>], iteration_bounds = array<i64: 1>, scalar_prefetch = 0 : i64, scratch_operands = 0 : i64, tpu.core_type = #tpu.core_type<tc>, window_params = [{transform_indices = @transform_0, window_bounds = array<i64: 128, 16>}, {pipeline_mode = #tpu.pipeline_mode<synchronous>, transform_indices = @transform_1, window_bounds = array<i64: 32, 16>}, {pipeline_mode = #tpu.pipeline_mode<synchronous>, transform_indices = @transform_2, window_bounds = array<i64: 32, 1>}, {pipeline_mode = #tpu.pipeline_mode<synchronous>, transform_indices = @transform_3, window_bounds = array<i64: 32, 1>}, {transform_indices = @transform_4, window_bounds = array<i64: 1, 1>}, {transform_indices = @transform_5, window_bounds = array<i64: 1, 128>}]} {
    %c0 = arith.constant 0 : index
    %c0_0 = arith.constant 0 : index
    %0 = vector.load %arg2[%c0, %c0_0] : memref<32x16xf32, #tpu.memory_space<vmem>>, vector<32x16xf32>
    %c0_1 = arith.constant 0 : index
    %c0_2 = arith.constant 0 : index
    %1 = vector.load %arg1[%c0_1, %c0_2] : memref<128x16xf32, #tpu.memory_space<vmem>>, vector<128x16xf32>
    %cst = arith.constant dense<0.000000e+00> : vector<32x128xf32>
    %2 = tpu.matmul %0, %1, %cst {dimension_numbers = #tpu.dot_dimension_numbers<[1], [1], [0], [0], [0, 0, 1, 0], [], []>, precision = #tpu.contract_precision<fp32>} : vector<32x16xf32>, vector<128x16xf32>, vector<32x128xf32> -> vector<32x128xf32>
    %c0_3 = arith.constant 0 : index
    %c0_4 = arith.constant 0 : index
    %3 = vector.load %arg3[%c0_3, %c0_4] : memref<32x1xf32, #tpu.memory_space<vmem>>, vector<32x1xf32>
    %4 = vector.broadcast %3 : vector<32x1xf32> to vector<32x128xf32>
    %5 = arith.addf %2, %4 : vector<32x128xf32>
    %cst_5 = arith.constant 0.000000e+00 : f32
    %6 = vector.broadcast %cst_5 : f32 to vector<32x128xf32>
    %7 = arith.maximumf %5, %6 : vector<32x128xf32>
    %c0_6 = arith.constant 0 : index
    %c0_7 = arith.constant 0 : index
    %8 = vector.load %arg4[%c0_6, %c0_7] : memref<32x1xf32, #tpu.memory_space<vmem>>, vector<32x1xf32>
    %9 = vector.broadcast %8 : vector<32x1xf32> to vector<32x128xf32>
    %10 = arith.mulf %7, %9 : vector<32x128xf32>
    %cst_8 = arith.constant dense<0.000000e+00> : vector<128xf32>
    %11 = vector.multi_reduction <add>, %10, %cst_8 [0] : vector<32x128xf32> to vector<128xf32>
    %12 = vector.shape_cast %11 : vector<128xf32> to vector<1x128xf32>
    %c0_9 = arith.constant 0 : index
    %c0_10 = arith.constant 0 : index
    %13 = memref.load %arg5[%c0_9, %c0_10] : memref<1x1xf32, #tpu.memory_space<smem>>
    %14 = vector.broadcast %13 : f32 to vector<1x128xf32>
    %15 = arith.addf %12, %14 : vector<1x128xf32>
    %c0_11 = arith.constant 0 : index
    %c0_12 = arith.constant 0 : index
    %16 = vector.load %arg6[%c0_11, %c0_12] : memref<1x128xf32, #tpu.memory_space<vmem>>, vector<1x128xf32>
    tpu.vector_store %arg6[%c0_11, %c0_12], %15 {strides = array<i32>} : memref<1x128xf32, #tpu.memory_space<vmem>>, vector<1x128xf32>,
    return
  }
  func.func @transform_0(%arg0: i32) -> (i32, i32) {
    %c0_i32 = arith.constant 0 : i32
    %c0_i32_0 = arith.constant 0 : i32
    return %arg0, %c0_i32 : i32, i32
  }
  func.func @transform_1(%arg0: i32) -> (i32, i32) {
    %c0_i32 = arith.constant 0 : i32
    %c0_i32_0 = arith.constant 0 : i32
    %c0_i32_1 = arith.constant 0 : i32
    return %c0_i32, %c0_i32_0 : i32, i32
  }
  func.func @transform_2(%arg0: i32) -> (i32, i32) {
    %c0_i32 = arith.constant 0 : i32
    %c0_i32_0 = arith.constant 0 : i32
    %c0_i32_1 = arith.constant 0 : i32
    return %c0_i32, %c0_i32_0 : i32, i32
  }
  func.func @transform_3(%arg0: i32) -> (i32, i32) {
    %c0_i32 = arith.constant 0 : i32
    %c0_i32_0 = arith.constant 0 : i32
    %c0_i32_1 = arith.constant 0 : i32
    return %c0_i32, %c0_i32_0 : i32, i32
  }
  func.func @transform_4(%arg0: i32) -> (i32, i32) {
    %c0_i32 = arith.constant 0 : i32
    %c0_i32_0 = arith.constant 0 : i32
    %c0_i32_1 = arith.constant 0 : i32
    return %c0_i32, %c0_i32_0 : i32, i32
  }
  func.func @transform_5(%arg0: i32) -> (i32, i32) {
    %c0_i32 = arith.constant 0 : i32
    %c0_i32_0 = arith.constant 0 : i32
    return %c0_i32, %arg0 : i32, i32
  }
}

</mosaic_0001>

<bundles_post_ra>
// kernel: tpu_custom_call.1
= control target key start
LH: loop header
LB: loop body
LE: loop exit
PB: predicated region body
PF: predicated region fallthrough
CT: control target
= control target key end

     0   :  { %vm66_vm0 = vcmask 130048   ;;  %s1043_s0 = inlined_call_operand.vmem [shape: f32[8,16], index: 0, kind: input, shape index: {}]   ;;  %s1044_s1 = inlined_call_operand.vmem [shape: f32[32,16], index: 1, kind: input, shape index: {}]   ;;  %s1045_s2 = inlined_call_operand.vmem [shape: f32[32,1], index: 2, kind: input, shape index: {}]   ;;  %s1046_s3 = inlined_call_operand.vmem [shape: f32[32,1], index: 3, kind: input, shape index: {}]   ;;  %s1047_s4 = inlined_call_operand.<no memory space> [shape: f32[1,1], index: 4, kind: input, shape index: {}]   ;;  %s1048_s5 = inlined_call_operand.hbm [shape: f32[1,8], index: 5, kind: output, shape index: {}]  }
   0x1   :  { %v41_v0 = vld [vmem:[%s1043_s0 + $0x78] sm:$0xff]  ;;  %v40_v1 = vld [vmem:[%s1043_s0 + $0x70] sm:$0xff]  ;;  %v39_v2 = vld [vmem:[%s1043_s0 + $0x68] sm:$0xff] }
   0x2   :  { %v125_v3 = vsel %vm66_vm0, %v41_v0, 0  ;;  %v122_v4 = vsel %vm66_vm0, %v40_v1, 0  ;;  %v119_v5 = vsel %vm66_vm0, %v39_v2, 0  ;;  %v38_v6 = vld [vmem:[%s1043_s0 + $0x60] sm:$0xff]  ;;  %v37_v7 = vld [vmem:[%s1043_s0 + $0x58] sm:$0xff]  ;;  %v36_v17 = vld [vmem:[%s1043_s0 + $0x50] sm:$0xff] }
   0x3   :  { %v735_v8 = vand.u32 4294901760, %v125_v3  ;;  %v737_v9 = vand.u32 4294901760, %v122_v4  ;;  %v739_v10 = vand.u32 4294901760, %v119_v5  ;;  %v116_v11 = vsel %vm66_vm0, %v38_v6, 0 }
   0x4   :  { %v742_v12 = vand.u32 4294901760, %v116_v11  ;;  %v113_v16 = vsel %vm66_vm0, %v37_v7, 0 }
   0x5   :  { %128 = vmatpush.xpose.msra.mxu0 %v735_v8  ;;  %v193_v13 = vsub.f32 %v125_v3, %v735_v8  ;;  %375 = vmatpush.xpose.msra.mxu3 %v735_v8  ;;  %v199_v14 = vsub.f32 %v122_v4, %v737_v9  ;;  %v205_v15 = vsub.f32 %v119_v5, %v739_v10 }
   0x6   :  { %11 = vsyncpa [#allocation4], 0  ;;  %v757_v20 = vand.u32 4294901760, %v113_v16  ;;  %v110_v21 = vsel %vm66_vm0, %v36_v17, 0  ;;  %v211_v24 = vsub.f32 %v116_v11, %v742_v12  ;;  %v35_v26 = vld [vmem:[%s1043_s0 + $0x48] sm:$0xff]  ;;  %v34_v34 = vld [vmem:[%s1043_s0 + $0x40] sm:$0xff] }
   0x7   :  { %307 = vmatpush.xpose.msra.mxu2 %v193_v13  ;;  %v753_v18 = vand.u32 4294901760, %v193_v13  ;;  %v755_v19 = vand.u32 4294901760, %v199_v14  ;;  %v765_v25 = vand.u32 4294901760, %v205_v15  ;;  %v770_v28 = vand.u32 4294901760, %v110_v21  ;;  %v33_v41 = vld [vmem:[%s1043_s0 + $0x38] sm:$0xff]  ;;  %v32_v48 = vld [vmem:[%s1043_s0 + $0x30] sm:$0xff] }
   0x8   :  { %v107_v29 = vsel %vm66_vm0, %v35_v26, 0  ;;  %v217_v32 = vsub.f32 %v113_v16, %v757_v20  ;;  %v776_v33 = vand.u32 4294901760, %v211_v24  ;;  %v104_v36 = vsel %vm66_vm0, %v34_v34, 0  ;;  %v31_v54 = vld [vmem:[%s1043_s0 + $0x28] sm:$0xff]  ;;  %v30_v62 = vld [vmem:[%s1043_s0 + $0x20] sm:$0xff]  ;;  %v29_v5 = vld [vmem:[%s1043_s0 + $0x18] sm:$0xff] }
   0x9   :  { %130 = vmatpush.xpose.msra.mxu0 %v737_v9  ;;  %v195_v22 = vsub.f32 %v193_v13, %v753_v18  ;;  %377 = vmatpush.xpose.msra.mxu3 %v737_v9  ;;  %v201_v23 = vsub.f32 %v199_v14, %v755_v19  ;;  %v207_v31 = vsub.f32 %v205_v15, %v765_v25  ;;  %v782_v35 = vand.u32 4294901760, %v107_v29  ;;  %v28_v16 = vld [vmem:[%s1043_s0 + $0x10] sm:$0xff]  ;;  %s686_s22 = smov [#allocation3]   ;;  %s613_s25 = sshll.u32 %s1048_s5, 4  ;;  %s614_s25 = int_to_ptr.hbm [resolvable:$true] %s613_s25 }
   0xa   :  { %v213_v38 = vsub.f32 %v211_v24, %v776_v33  ;;  %v223_v39 = vsub.f32 %v110_v21, %v770_v28  ;;  %v788_v40 = vand.u32 4294901760, %v217_v32  ;;  %v794_v42 = vand.u32 4294901760, %v104_v36  ;;  %s611_s23 = sshll.u32 %s686_s22, 4  ;;  %s612_s23 = int_to_ptr.vmem [resolvable:$true] %s611_s23 }
   0xb   :  { %310 = vmatpush.xpose.msra.mxu2 %v199_v14  ;;  %v196_v27 = vand.u32 4294901760, %v195_v22  ;;  %v202_v30 = vand.u32 4294901760, %v201_v23  ;;  %v208_v37 = vand.u32 4294901760, %v207_v31  ;;  %v229_v45 = vsub.f32 %v107_v29, %v782_v35 }
   0xc   :  { %v214_v43 = vand.u32 4294901760, %v213_v38  ;;  %v219_v44 = vsub.f32 %v217_v32, %v788_v40  ;;  %v799_v46 = vand.u32 4294901760, %v223_v39  ;;  %v101_v47 = vsel %vm66_vm0, %v33_v41, 0 }
   0xd   :  { %132 = vmatpush.xpose.msra.mxu0 %v739_v10  ;;  %197 = vmatpush.xpose.msra.mxu1 %v196_v27  ;;  %v235_v49 = vsub.f32 %v104_v36, %v794_v42  ;;  %v809_v52 = vand.u32 4294901760, %v101_v47  ;;  %v811_v53 = vand.u32 4294901760, %v229_v45  ;;  %v98_v55 = vsel %vm66_vm0, %v32_v48, 0  ;;  %v27_v27 = vld [vmem:[%s1043_s0 + $0x8] sm:$0xff] }
   0xe   :  { %379 = vmatpush.xpose.msra.mxu3 %v739_v10  ;;  %v220_v50 = vand.u32 4294901760, %v219_v44  ;;  %v225_v51 = vsub.f32 %v223_v39, %v799_v46  ;;  %v95_v57 = vsel %vm66_vm0, %v31_v54, 0  ;;  %v824_v61 = vand.u32 4294901760, %v98_v55  ;;  %v22_v54 = vld [vmem:[%s1044_s1] sm:$0xff] }
   0xf   :  { %313 = vmatpush.xpose.msra.mxu2 %v205_v15  ;;  %v818_v56 = vand.u32 4294901760, %v235_v49  ;;  %v231_v59 = vsub.f32 %v229_v45, %v811_v53  ;;  %v241_v60 = vsub.f32 %v101_v47, %v809_v52  ;;  %v831_v0 = vand.u32 4294901760, %v95_v57 }
  0x10   :  { %v226_v58 = vand.u32 4294901760, %v225_v51  ;;  %v247_v2 = vsub.f32 %v98_v55, %v824_v61  ;;  %v92_v4 = vsel %vm66_vm0, %v30_v62, 0  ;;  %v89_v15 = vsel %vm66_vm0, %v29_v5, 0 }
  0x11   :  { %134 = vmatpush.xpose.msra.mxu0 %v742_v12  ;;  %203 = vmatpush.xpose.msra.mxu1 %v202_v30  ;;  %v237_v63 = vsub.f32 %v235_v49, %v818_v56  ;;  %v232_v1 = vand.u32 4294901760, %v231_v59  ;;  %v835_v3 = vand.u32 4294901760, %v241_v60  ;;  %v842_v7 = vand.u32 4294901760, %v92_v4 }
  0x12   :  { %381 = vmatpush.xpose.msra.mxu3 %v742_v12  ;;  %v253_v13 = vsub.f32 %v95_v57, %v831_v0  ;;  %v847_v14 = vand.u32 4294901760, %v247_v2  ;;  %v854_v17 = vand.u32 4294901760, %v89_v15  ;;  %v86_v26 = vsel %vm66_vm0, %v28_v16, 0 }
  0x13   :  { %316 = vmatpush.xpose.msra.mxu2 %v211_v24  ;;  %v238_v6 = vand.u32 4294901760, %v237_v63  ;;  %v243_v11 = vsub.f32 %v241_v60, %v835_v3  ;;  %v259_v23 = vsub.f32 %v92_v4, %v842_v7  ;;  %v83_v36 = vsel %vm66_vm0, %v27_v27, 0 }
  0x14   :  { %v249_v22 = vsub.f32 %v247_v2, %v847_v14  ;;  %v859_v24 = vand.u32 4294901760, %v253_v13  ;;  %v265_v29 = vsub.f32 %v89_v15, %v854_v17  ;;  %v883_v44 = vand.u32 4294901760, %v83_v36 }
  0x15   :  { %136 = vmatpush.xpose.msra.mxu0 %v757_v20  ;;  %209 = vmatpush.xpose.msra.mxu1 %v208_v37  ;;  %v244_v21 = vand.u32 4294901760, %v243_v11  ;;  %v871_v34 = vand.u32 4294901760, %v259_v23  ;;  %v26_v37 = vld [vmem:[%s1043_s0] sm:$0xff]  ;;  %v68_v55 = vsel %vm66_vm0, %v22_v54, 0  ;;  %v23_v11 = vld [vmem:[%s1044_s1 + $0x8] sm:$0xff] }
  0x16   :  { %383 = vmatpush.xpose.msra.mxu3 %v757_v20  ;;  %v250_v30 = vand.u32 4294901760, %v249_v22  ;;  %v255_v31 = vsub.f32 %v253_v13, %v859_v24  ;;  %v878_v38 = vand.u32 4294901760, %v265_v29  ;;  %v899_v57 = vand.u32 4294901760, %v68_v55 }
  0x17   :  { %319 = vmatpush.xpose.msra.mxu2 %v217_v32  ;;  %v869_v32 = vand.u32 4294901760, %v86_v26  ;;  %v261_v41 = vsub.f32 %v259_v23, %v871_v34 }
  0x18   :  { %v267_v47 = vsub.f32 %v265_v29, %v878_v38  ;;  %v160_v63 = vsub.f32 %v68_v55, %v899_v57 }
  0x19   :  { %138 = vmatpush.xpose.msra.mxu0 %v770_v28  ;;  %215 = vmatpush.xpose.msra.mxu1 %v214_v43  ;;  %v271_v43 = vsub.f32 %v86_v26, %v869_v32  ;;  %v262_v48 = vand.u32 4294901760, %v261_v41 }
  0x1a   :  { %385 = vmatpush.xpose.msra.mxu3 %v770_v28 }
  0x1b   :  { %322 = vmatpush.xpose.msra.mxu2 %v223_v39  ;;  %v256_v39 = vand.u32 4294901760, %v255_v31  ;;  %v892_v51 = vand.u32 4294901760, %v271_v43 }
  0x1d   :  { %140 = vmatpush.xpose.msra.mxu0 %v782_v35  ;;  %221 = vmatpush.xpose.msra.mxu1 %v220_v50  ;;  %v273_v59 = vsub.f32 %v271_v43, %v892_v51 }
  0x1e   :  { %387 = vmatpush.xpose.msra.mxu3 %v782_v35 }
  0x1f   :  { %325 = vmatpush.xpose.msra.mxu2 %v229_v45  ;;  %v80_v45 = vsel %vm66_vm0, %v26_v37, 0 }
  0x20   :  { %v890_v50 = vand.u32 4294901760, %v80_v45 }
  0x21   :  { %142 = vmatpush.xpose.msra.mxu0 %v794_v42  ;;  %227 = vmatpush.xpose.msra.mxu1 %v226_v58  ;;  %v268_v58 = vand.u32 4294901760, %v267_v47  ;;  %v685_v47 = vmov 0  }
  0x22   :  { %389 = vmatpush.xpose.msra.mxu3 %v794_v42  ;;  %656 = vset.pattern.permute.xlu0 %v685_v47 }
  0x23   :  { %328 = vmatpush.xpose.msra.mxu2 %v235_v49  ;;  %v277_v49 = vsub.f32 %v83_v36, %v883_v44  ;;  %657 = vset.pattern.permute.xlu1 %v685_v47 }
  0x24   :  { %658 = vset.pattern.permute.xlu2 %v685_v47 }
  0x25   :  { %144 = vmatpush.xpose.msra.mxu0 %v809_v52  ;;  %233 = vmatpush.xpose.msra.mxu1 %v232_v1  ;;  %v904_v62 = vand.u32 4294901760, %v277_v49  ;;  %v161_v1 = vand.u32 4294901760, %v160_v63 }
  0x26   :  { %391 = vmatpush.xpose.msra.mxu3 %v809_v52 }
  0x27   :  { %331 = vmatpush.xpose.msra.mxu2 %v241_v60  ;;  %v283_v60 = vsub.f32 %v80_v45, %v890_v50  ;;  %v279_v4 = vsub.f32 %v277_v49, %v904_v62  ;;  %v42_v45 = vld [vmem:[%s1045_s2] sm:$0xff] }
  0x28   :  { %48 = vperm.xlu0 %656, %v42_v45  }
  0x29   :  { %146 = vmatpush.xpose.msra.mxu0 %v824_v61  ;;  %239 = vmatpush.xpose.msra.mxu1 %v238_v6  ;;  %v910_v5 = vand.u32 4294901760, %v283_v60  ;;  %v162_v6 = vsub.f32 %v160_v63, %v161_v1 }
  0x2a   :  { %393 = vmatpush.xpose.msra.mxu3 %v824_v61 }
  0x2b   :  { %334 = vmatpush.xpose.msra.mxu2 %v247_v2  ;;  %v274_v2 = vand.u32 4294901760, %v273_v59  ;;  %v163_v16 = vand.u32 4294901760, %v162_v6  ;;  %v285_v22 = vsub.f32 %v283_v60, %v910_v5 }
  0x2d   :  { %148 = vmatpush.xpose.msra.mxu0 %v831_v0  ;;  %245 = vmatpush.xpose.msra.mxu1 %v244_v21  ;;  %v280_v21 = vand.u32 4294901760, %v279_v4  ;;  %v286_v27 = vand.u32 4294901760, %v285_v22 }
  0x2e   :  { %395 = vmatpush.xpose.msra.mxu3 %v831_v0 }
  0x2f   :  { %337 = vmatpush.xpose.msra.mxu2 %v253_v13  ;;  %v71_v13 = vsel %vm66_vm0, %v23_v11, 0 }
  0x30   :  { %v917_v15 = vand.u32 4294901760, %v71_v13 }
  0x31   :  { %150 = vmatpush.xpose.msra.mxu0 %v842_v7  ;;  %251 = vmatpush.xpose.msra.mxu1 %v250_v30  ;;  %v24_v30 = vld [vmem:[%s1044_s1 + $0x10] sm:$0xff] }
  0x32   :  { %397 = vmatpush.xpose.msra.mxu3 %v842_v7  ;;  %v74_v31 = vsel %vm66_vm0, %v24_v30, 0 }
  0x33   :  { %340 = vmatpush.xpose.msra.mxu2 %v259_v23  ;;  %v168_v23 = vsub.f32 %v71_v13, %v917_v15  ;;  %v932_v36 = vand.u32 4294901760, %v74_v31 }
  0x35   :  { %152 = vmatpush.xpose.msra.mxu0 %v854_v17  ;;  %257 = vmatpush.xpose.msra.mxu1 %v256_v39  ;;  %v169_v26 = vand.u32 4294901760, %v168_v23  ;;  %v176_v37 = vsub.f32 %v74_v31, %v932_v36 }
  0x36   :  { %399 = vmatpush.xpose.msra.mxu3 %v854_v17 }
  0x37   :  { %343 = vmatpush.xpose.msra.mxu2 %v265_v29  ;;  %v170_v29 = vsub.f32 %v168_v23, %v169_v26  ;;  %v177_v39 = vand.u32 4294901760, %v176_v37 }
  0x39   :  { %154 = vmatpush.xpose.msra.mxu0 %v869_v32  ;;  %263 = vmatpush.xpose.msra.mxu1 %v262_v48  ;;  %v178_v41 = vsub.f32 %v176_v37, %v177_v39 }
  0x3a   :  { %401 = vmatpush.xpose.msra.mxu3 %v869_v32 }
  0x3b   :  { %346 = vmatpush.xpose.msra.mxu2 %v271_v43 }
  0x3d   :  { %156 = vmatpush.xpose.msra.mxu0 %v883_v44  ;;  %269 = vmatpush.xpose.msra.mxu1 %v268_v58 }
  0x3e   :  { %403 = vmatpush.xpose.msra.mxu3 %v883_v44 }
  0x3f   :  { %349 = vmatpush.xpose.msra.mxu2 %v277_v49  ;;  %v43_v49 = vld [vmem:[%s1045_s2 + $0x8] sm:$0xff] }
  0x40   :  { %53 = vperm.xlu0 %656, %v43_v49  }
  0x41   :  { %158 = vmatpush.xpose.msra.mxu0 %v890_v50  ;;  %275 = vmatpush.xpose.msra.mxu1 %v274_v2 }
  0x42   :  { %405 = vmatpush.xpose.msra.mxu3 %v890_v50 }
  0x43   :  { %352 = vmatpush.xpose.msra.mxu2 %v283_v60 }
  0x44   :  { %164 = vmatmul.f32.vlgmr.msra.gmra.mxu0 %v163_v16 }
  0x45   :  { %434 = vmatpush.xpose.msrb.mxu0 %v753_v18  ;;  %281 = vmatpush.xpose.msra.mxu1 %v280_v21 }
  0x46   :  { %638 = vmatpush.xpose.msrb.mxu3 %v735_v8  ;;  %355 = vmatmul.f32.vlgmr.msra.gmra.mxu2 %v160_v63 }
  0x47   :  { %622 = vmatpush.xpose.msrb.mxu2 %v753_v18  ;;  %409 = vmatmul.f32.vlgmr.msra.gmra.mxu3 %v161_v1  ;;  %v171_v18 = vand.u32 4294901760, %v170_v29 }
  0x49   :  { %438 = vmatpush.xpose.msrb.mxu0 %v755_v19  ;;  %287 = vmatpush.xpose.msra.mxu1 %v286_v27 }
  0x4a   :  { %639 = vmatpush.xpose.msrb.mxu3 %v737_v9 }
  0x4b   :  { %623 = vmatpush.xpose.msrb.mxu2 %v755_v19  ;;  %v25_v19 = vld [vmem:[%s1044_s1 + $0x18] sm:$0xff] }
  0x4c   :  { %172 = vmatmul.f32.gmra.mxu0 %v171_v18  ;;  %289 = vmatmul.f32.vlgmr.msra.gmra.mxu1 %v899_v57 }
  0x4d   :  { %442 = vmatpush.xpose.msrb.mxu0 %v765_v25  ;;  %513 = vmatpush.xpose.msrb.mxu1 %v735_v8  ;;  %v77_v8 = vsel %vm66_vm0, %v25_v19, 0 }
  0x4e   :  { %640 = vmatpush.xpose.msrb.mxu3 %v739_v10  ;;  %360 = vmatmul.f32.gmra.mxu2 %v168_v23  ;;  %v948_v43 = vand.u32 4294901760, %v77_v8 }
  0x4f   :  { %624 = vmatpush.xpose.msrb.mxu2 %v765_v25  ;;  %415 = vmatmul.f32.gmra.mxu3 %v169_v26  ;;  %v179_v25 = vand.u32 4294901760, %v178_v41 }
  0x50   :  { %v184_v48 = vsub.f32 %v77_v8, %v948_v43 }
  0x51   :  { %446 = vmatpush.xpose.msrb.mxu0 %v776_v33  ;;  %515 = vmatpush.xpose.msrb.mxu1 %v737_v9 }
  0x52   :  { %641 = vmatpush.xpose.msrb.mxu3 %v742_v12  ;;  %v185_v9 = vand.u32 4294901760, %v184_v48 }
  0x53   :  { %625 = vmatpush.xpose.msrb.mxu2 %v776_v33 }
  0x54   :  { %180 = vmatmul.f32.gmra.mxu0 %v179_v25  ;;  %293 = vmatmul.f32.gmra.mxu1 %v917_v15  ;;  %v186_v33 = vsub.f32 %v184_v48, %v185_v9 }
  0x55   :  { %450 = vmatpush.xpose.msrb.mxu0 %v788_v40  ;;  %517 = vmatpush.xpose.msrb.mxu1 %v739_v10 }
  0x56   :  { %642 = vmatpush.xpose.msrb.mxu3 %v757_v20  ;;  %365 = vmatmul.f32.gmra.mxu2 %v176_v37  ;;  %v187_v10 = vand.u32 4294901760, %v186_v33 }
  0x57   :  { %626 = vmatpush.xpose.msrb.mxu2 %v788_v40  ;;  %421 = vmatmul.f32.gmra.mxu3 %v177_v39  ;;  %v565_v40 = vld [vmem:[%s1046_s3] sm:$0xff] }
  0x58   :  { %571 = vperm.xlu2 %658, %v565_v40  }
  0x59   :  { %454 = vmatpush.xpose.msrb.mxu0 %v799_v46  ;;  %519 = vmatpush.xpose.msrb.mxu1 %v742_v12  ;;  %v44_v12 = vld [vmem:[%s1045_s2 + $0x10] sm:$0xff] }
  0x5a   :  { %643 = vmatpush.xpose.msrb.mxu3 %v770_v28  ;;  %58 = vperm.xlu1 %657, %v44_v12  }
  0x5b   :  { %627 = vmatpush.xpose.msrb.mxu2 %v799_v46 }
  0x5c   :  { %188 = vmatmul.f32.gmra.mxu0 %v187_v10  ;;  %297 = vmatmul.f32.gmra.mxu1 %v932_v36 }
  0x5d   :  { %458 = vmatpush.xpose.msrb.mxu0 %v811_v53  ;;  %521 = vmatpush.xpose.msrb.mxu1 %v757_v20  ;;  %v45_v20 = vld [vmem:[%s1045_s2 + $0x18] sm:$0xff] }
  0x5e   :  { %644 = vmatpush.xpose.msrb.mxu3 %v782_v35  ;;  %370 = vmatmul.f32.gmra.mxu2 %v184_v48 }
  0x5f   :  { %628 = vmatpush.xpose.msrb.mxu2 %v811_v53  ;;  %427 = vmatmul.f32.gmra.mxu3 %v185_v9 }
  0x61   :  { %462 = vmatpush.xpose.msrb.mxu0 %v818_v56  ;;  %523 = vmatpush.xpose.msrb.mxu1 %v770_v28  ;;  %v567_v28 = vld [vmem:[%s1046_s3 + $0x10] sm:$0xff] }
  0x62   :  { %645 = vmatpush.xpose.msrb.mxu3 %v794_v42  ;;  %63 = vperm.xlu1 %657, %v45_v20  }
  0x63   :  { %629 = vmatpush.xpose.msrb.mxu2 %v818_v56  ;;  %581 = vperm.xlu0 %656, %v567_v28  }
  0x64   :  { %301 = vmatmul.f32.gmra.mxu1 %v948_v43 }
  0x65   :  { %466 = vmatpush.xpose.msrb.mxu0 %v835_v3  ;;  %525 = vmatpush.xpose.msrb.mxu1 %v782_v35  ;;  %v568_v35 = vld [vmem:[%s1046_s3 + $0x18] sm:$0xff] }
  0x66   :  { %646 = vmatpush.xpose.msrb.mxu3 %v809_v52 }
  0x67   :  { %630 = vmatpush.xpose.msrb.mxu2 %v835_v3 }
  0x69   :  { %470 = vmatpush.xpose.msrb.mxu0 %v847_v14  ;;  %527 = vmatpush.xpose.msrb.mxu1 %v794_v42  ;;  %v566_v42 = vld [vmem:[%s1046_s3 + $0x8] sm:$0xff] }
  0x6a   :  { %647 = vmatpush.xpose.msrb.mxu3 %v824_v61  ;;  %586 = vperm.xlu1 %657, %v568_v35  }
  0x6b   :  { %631 = vmatpush.xpose.msrb.mxu2 %v847_v14  ;;  %576 = vperm.xlu2 %658, %v566_v42  }
  0x6d   :  { %474 = vmatpush.xpose.msrb.mxu0 %v859_v24  ;;  %529 = vmatpush.xpose.msrb.mxu1 %v809_v52 }
  0x6e   :  { %648 = vmatpush.xpose.msrb.mxu3 %v831_v0 }
  0x6f   :  { %632 = vmatpush.xpose.msrb.mxu2 %v859_v24 }
  0x71   :  { %478 = vmatpush.xpose.msrb.mxu0 %v871_v34  ;;  %531 = vmatpush.xpose.msrb.mxu1 %v824_v61 }
  0x72   :  { %649 = vmatpush.xpose.msrb.mxu3 %v842_v7 }
  0x73   :  { %633 = vmatpush.xpose.msrb.mxu2 %v871_v34 }
  0x75   :  { %482 = vmatpush.xpose.msrb.mxu0 %v878_v38  ;;  %533 = vmatpush.xpose.msrb.mxu1 %v831_v0 }
  0x76   :  { %650 = vmatpush.xpose.msrb.mxu3 %v854_v17 }
  0x77   :  { %634 = vmatpush.xpose.msrb.mxu2 %v878_v38 }
  0x79   :  { %486 = vmatpush.xpose.msrb.mxu0 %v892_v51  ;;  %535 = vmatpush.xpose.msrb.mxu1 %v842_v7 }
  0x7a   :  { %651 = vmatpush.xpose.msrb.mxu3 %v869_v32 }
  0x7b   :  { %635 = vmatpush.xpose.msrb.mxu2 %v892_v51 }
  0x7d   :  { %490 = vmatpush.xpose.msrb.mxu0 %v904_v62  ;;  %537 = vmatpush.xpose.msrb.mxu1 %v854_v17 }
  0x7e   :  { %652 = vmatpush.xpose.msrb.mxu3 %v883_v44 }
  0x7f   :  { %636 = vmatpush.xpose.msrb.mxu2 %v904_v62 }
  0x81   :  { %494 = vmatpush.xpose.msrb.mxu0 %v910_v5  ;;  %539 = vmatpush.xpose.msrb.mxu1 %v869_v32 }
  0x82   :  { %653 = vmatpush.xpose.msrb.mxu3 %v890_v50 }
  0x83   :  { %637 = vmatpush.xpose.msrb.mxu2 %v910_v5 }
  0x84   :  { %496 = vmatmul.f32.vlgmr.msrb.gmra.mxu0 %v899_v57 }
  0x85   :  { %541 = vmatpush.xpose.msrb.mxu1 %v883_v44  ;;  %553 = vmatmul.f32.vlgmr.msrb.gmra.mxu3 %v932_v36 }
  0x86   :  { %504 = vmatmul.f32.vlgmr.msrb.gmra.mxu2 %v932_v36 }
  0x89   :  { %543 = vmatpush.xpose.msrb.mxu1 %v890_v50 }
  0x8c   :  { %500 = vmatmul.f32.gmra.mxu0 %v917_v15  ;;  %545 = vmatmul.f32.vlgmr.msrb.gmra.mxu1 %v899_v57 }
  0x8d   :  { %557 = vmatmul.f32.gmra.mxu3 %v948_v43 }
  0x8e   :  { %508 = vmatmul.f32.gmra.mxu2 %v948_v43 }
  0x94   :  { %549 = vmatmul.f32.gmra.mxu1 %v917_v15 }
  0x9a   :  { %v49_v32 = vpop.permute.xlu0 %48 }
  0xb2   :  { %v54_v57 = vpop.permute.xlu0 %53  ;;  %v572_v27 = vpop.permute.xlu2 %571 }
  0xc1   :  { %v165_v46 = vpop.f32.mrf.mxu0 }
  0xc2   :  { %v166_v51 = vadd.f32 %v165_v46, %v49_v32 }
  0xc5   :  { %v577_v10 = vpop.permute.xlu2 %576 }
  0xc9   :  { %v356_v53 = vpop.f32.mrf.mxu2  ;;  %v290_v56 = vpop.f32.mrf.mxu1 }
  0xca   :  { %v410_v52 = vpop.f32.mrf.mxu3  ;;  %v173_v61 = vpop.f32.mrf.mxu0  ;;  %v291_v59 = vadd.f32 %v290_v56, %v166_v51 }
  0xcb   :  { %v174_v60 = vadd.f32 %v173_v61, %v54_v57 }
  0xcc   :  { %v59_v38 = vpop.permute.xlu1 %58  ;;  %v357_v4 = vadd.f32 %v356_v53, %v291_v59 }
  0xce   :  { %v411_v21 = vadd.f32 %v410_v52, %v357_v4 }
  0xd1   :  { %v361_v3 = vpop.f32.mrf.mxu2  ;;  %v294_v7 = vpop.f32.mrf.mxu1 }
  0xd2   :  { %v416_v0 = vpop.f32.mrf.mxu3  ;;  %v181_v14 = vpop.f32.mrf.mxu0  ;;  %v295_v5 = vadd.f32 %v294_v7, %v174_v60 }
  0xd3   :  { %v182_v54 = vadd.f32 %v181_v14, %v59_v38  ;;  %v603_v14 = vstv %s1047_s4 }
  0xd4   :  { %v64_v63 = vpop.permute.xlu1 %63  ;;  %v362_v22 = vadd.f32 %v361_v3, %v295_v5 }
  0xd5   :  { %v582_v28 = vpop.permute.xlu0 %581 }
  0xd6   :  { %v417_v36 = vadd.f32 %v416_v0, %v362_v22 }
  0xd9   :  { %v366_v24 = vpop.f32.mrf.mxu2  ;;  %v298_v34 = vpop.f32.mrf.mxu1 }
  0xda   :  { %v422_v17 = vpop.f32.mrf.mxu3  ;;  %v189_v44 = vpop.f32.mrf.mxu0  ;;  %v299_v62 = vadd.f32 %v298_v34, %v182_v54 }
  0xdb   :  { %v190_v1 = vadd.f32 %v189_v44, %v64_v63 }
  0xdc   :  { %v367_v6 = vadd.f32 %v366_v24, %v299_v62  ;;  %v587_v42 = vpop.permute.xlu1 %586 }
  0xde   :  { %v423_v23 = vadd.f32 %v422_v17, %v367_v6 }
  0xe1   :  { %v371_v55 = vpop.f32.mrf.mxu2  ;;  %v302_v58 = vpop.f32.mrf.mxu1 }
  0xe2   :  { %v428_v50 = vpop.f32.mrf.mxu3  ;;  %v303_v11 = vadd.f32 %v302_v58, %v190_v1 }
  0xe4   :  { %v372_v26 = vadd.f32 %v371_v55, %v303_v11 }
  0xe6   :  { %v429_v37 = vadd.f32 %v428_v50, %v372_v26 }
 0x101   :  { %v497_v2 = vpop.f32.mrf.mxu0 }
 0x102   :  { %v498_v29 = vadd.f32 %v497_v2, %v411_v21 }
 0x108   :  { %v554_v13 = vpop.f32.mrf.mxu3 }
 0x109   :  { %v505_v15 = vpop.f32.mrf.mxu2  ;;  %v546_v16 = vpop.f32.mrf.mxu1 }
 0x10a   :  { %v506_v30 = vadd.f32 %v505_v15, %v423_v23  ;;  %v501_v31 = vpop.f32.mrf.mxu0  ;;  %v547_v18 = vadd.f32 %v546_v16, %v498_v29 }
 0x10b   :  { %v502_v39 = vadd.f32 %v501_v31, %v417_v36 }
 0x10c   :  { %v555_v41 = vadd.f32 %v554_v13, %v506_v30  ;;  %v561_v45 = vmax.f32 %v547_v18, 0.0 }
 0x10e   :  { %v563_v9 = vmax.f32 %v555_v41, 0.0  ;;  %v589_v49 = vmul.f32 %v572_v27, %v561_v45 }
 0x110   :  { %v558_v8 = vpop.f32.mrf.mxu3  ;;  %v591_v35 = vmul.f32 %v582_v28, %v563_v9 }
 0x111   :  { %v509_v19 = vpop.f32.mrf.mxu2  ;;  %v550_v25 = vpop.f32.mrf.mxu1 }
 0x112   :  { %v510_v43 = vadd.f32 %v509_v19, %v429_v37  ;;  %v551_v47 = vadd.f32 %v550_v25, %v502_v39 }
 0x114   :  { %v559_v48 = vadd.f32 %v558_v8, %v510_v43  ;;  %v562_v33 = vmax.f32 %v551_v47, 0.0 }
 0x116   :  { %v590_v12 = vmul.f32 %v577_v10, %v562_v33  ;;  %v564_v20 = vmax.f32 %v559_v48, 0.0 }
 0x118   :  { %v593_v40 = vadd.f32 %v590_v12, %v589_v49  ;;  %v592_v46 = vmul.f32 %v587_v42, %v564_v20 }
 0x11a   :  { %v594_v52 = vadd.f32 %v593_v40, %v591_v35 }
 0x11c   :  { %v595_v53 = vadd.f32 %v594_v52, %v592_v46 }
 0x11e   :  { %v596_v56 = vrot.slane %v595_v53, 4 }
 0x120   :  { %v597_v61 = vadd.f32 %v596_v56, %v595_v53 }
 0x122   :  { %v598_v0 = vrot.slane %v597_v61, 2 }
 0x124   :  { %v599_v3 = vadd.f32 %v598_v0, %v597_v61 }
 0x126   :  { %v600_v7 = vrot.slane %v599_v3, 1 }
 0x128   :  { %v601_v17 = vadd.f32 %v600_v7, %v599_v3 }
 0x12a   :  { %v604_v24 = vadd.f32 %v603_v14, %v601_v17 }
 0x12c   :  { %605 = vst [vmem:[#allocation3] sm:$0x1] %v604_v24 }
 0x12d   :  { %616 = dma.vmem_to_hbm [thread:$0]  %s612_s23, 16, %s614_s25, [#allocation4]  }
 0x12e   :  { %683 = dma.done.wait [#allocation4], 16  }
 0x12f   :  { %684 = vsyncadd [#allocation4], 4294967280 }
 0x130   :  { %621 = vsyncpa [#allocation4], 1 }

</bundles_post_ra>
